<compile_context>
chip_gen: v5e
topology: v5e:2x2
jax: 0.10.0
libtpu: 0.0.40
codegen_flags: <defaults>
</compile_context>

<pallas_src>
import jax
import jax.numpy as jnp
import numpy as np
from jax.experimental import pallas as pl
from jax.experimental.pallas import tpu as pltpu


def rgcn_kernel(a_ref, xw_ref, xwl_ref, bias_ref, o_ref, acc_ref):
    """Grid = (dst tiles [parallel], src tiles [arbitrary reduction]).

    a_ref    : (R, TN, TS)  bf16  pre-normalized adjacency (A_r * 1/deg), this (dst, src) tile
    xw_ref   : (R, TS, Fp)  bf16  hoisted per-relation feature transforms X @ W_r, this src tile
    xwl_ref  : (TN, Fp)     f32   hoisted self-loop transform X @ W_loop, this dst tile
    bias_ref : (1, Fp)      f32
    o_ref    : (TN, Fp)     f32   output tile (written once, at the last src step)
    acc_ref  : (TN, Fp)     f32   VMEM scratch accumulator (persists across src steps)
    """
    k = pl.program_id(1)

    @pl.when(k == 0)
    def _():
        # Initialize with the self-loop term (already X @ W_loop from the wrapper).
        acc_ref[...] = xwl_ref[...]

    # sum_r (A_norm_r @ (X @ W_r)) over this source tile.
    # bf16 operands, f32 MXU accumulation; pure acc += dot(...) (no VPU scaling
    # in between) so the R matmuls chain straight into the accumulator.
    R = a_ref.shape[0]
    for r in range(R):
        acc_ref[...] += jnp.dot(a_ref[r], xw_ref[r],
                                preferred_element_type=jnp.float32)

    @pl.when(k == pl.num_programs(1) - 1)
    def _():
        # bias + ReLU fused into the single lane-dense store.
        o_ref[...] = jnp.maximum(acc_ref[...] + bias_ref[...], 0.0).astype(o_ref.dtype)
    # TODO(synk): dropout with p > 0 would need pltpu.prng_seed/prng_random_bits;
    # p = 0.0 is the identity.


def rel_graph_conv_layer(adj, x, w_rel, w_loop, bias, *, tn=128, ts=512,
                         vmem_limit_bytes=None):
    """adj: [R, N, N] (0/1), x: [N, F_in], w_rel: [R, F_in, F_out],
    w_loop: [F_in, F_out], bias: [F_out] -> [N, F_out].

    Tile sizing guidance (per TPU generation):
      * v7x (64 MiB VMEM, 3.2 TB/s HBM): tn=256, ts=2048 keeps double-buffered
        A(bf16)+XW(bf16) ~10 MiB and fits the default scoped limit.
      * v6e / v5e (128 MiB VMEM): tn=256-512, ts=4096-8192 with an explicit
        vmem_limit_bytes to amortize per-step overhead against ~0.8-1.4 TB/s HBM.
    """
    R, N, _ = adj.shape
    F_in = x.shape[1]
    F_out = w_rel.shape[2]

    # Lane-dense output feature dim: pad F_out up to a multiple of 128.
    Fp = -(-F_out // 128) * 128
    pad_f = Fp - F_out

    adj = adj.astype(jnp.float32)
    x32 = x.astype(jnp.float32)

    # Degree normalization precomputed over FULL rows (required once the source
    # axis is tiled inside the kernel), folded into the adjacency.
    deg = jnp.sum(adj, axis=-1, keepdims=True)                     # [R, N, 1]
    a_norm = adj / jnp.maximum(deg, 1.0)                           # f32

    # Pad dst / src node axes independently up to tile multiples. Padded rows
    # have degree 0 (already clamped) and zero adjacency -> zero contribution.
    Nd = -(-N // tn) * tn
    Ns = -(-N // ts) * ts
    a_norm = jnp.pad(a_norm, ((0, 0), (0, Nd - N), (0, Ns - N))).astype(jnp.bfloat16)

    # Hoisted feature transforms: computed ONCE here, not per destination tile.
    w_rel_p = jnp.pad(w_rel.astype(jnp.float32), ((0, 0), (0, 0), (0, pad_f)))
    w_loop_p = jnp.pad(w_loop.astype(jnp.float32), ((0, 0), (0, pad_f)))

    xw_rel = jnp.einsum("nf,rfo->rno", x32, w_rel_p)               # [R, N, Fp] f32
    xw_rel = jnp.pad(xw_rel, ((0, 0), (0, Ns - N), (0, 0))).astype(jnp.bfloat16)
    xw_loop = jnp.pad(jnp.dot(x32, w_loop_p), ((0, Nd - N), (0, 0)))  # [Nd, Fp] f32

    bias_p = jnp.pad(bias.reshape(1, -1).astype(jnp.float32), ((0, 0), (0, pad_f)))

    grid = (Nd // tn, Ns // ts)

    out_padded = pl.pallas_call(
        rgcn_kernel,
        out_shape=jax.ShapeDtypeStruct((Nd, Fp), jnp.float32),
        grid_spec=pltpu.PrefetchScalarGridSpec(
            num_scalar_prefetch=0,
            grid=grid,
            in_specs=[
                pl.BlockSpec((R, tn, ts), lambda i, k: (0, i, k)),   # normalized A tile
                pl.BlockSpec((R, ts, Fp), lambda i, k: (0, k, 0)),   # hoisted X @ W_r, src tile
                pl.BlockSpec((tn, Fp), lambda i, k: (i, 0)),         # hoisted X @ W_loop, dst tile
                pl.BlockSpec((1, Fp), lambda i, k: (0, 0)),          # bias (grid-invariant)
            ],
            out_specs=pl.BlockSpec((tn, Fp), lambda i, k: (i, 0)),
            scratch_shapes=[pltpu.VMEM((tn, Fp), jnp.float32)],
        ),
        compiler_params=pltpu.CompilerParams(
            dimension_semantics=("parallel", "arbitrary"),
            vmem_limit_bytes=vmem_limit_bytes,
        ),
    )(a_norm, xw_rel, xw_loop, bias_p)

    # Drop node padding rows and zero-padded output columns.
    return out_padded[:N, :F_out]


def reference(adj, x, w_rel, w_loop, bias):
    hp = jax.lax.Precision.HIGHEST
    deg = jnp.maximum(jnp.sum(adj, axis=-1, keepdims=True), 1.0)          # [R, N, 1]
    msg = jnp.einsum("rnm,mf->rnf", adj, x, precision=hp) / deg           # [R, N, F_in]
    h = jnp.einsum("rnf,rfo->no", msg, w_rel, precision=hp)               # sum over relations
    h = h + jnp.dot(x, w_loop, precision=hp)
    h = h + bias.reshape(1, -1)
    return jnp.maximum(h, 0.0)


if __name__ == "__main__":
    # Module configuration (synthetic, deterministic). N and feature sizes are
    # deliberately not multiples of the tile so the padding path is exercised,
    # and tn=ts=128 gives a (2, 2) grid: 2 dst tiles x 2 src reduction steps.
    N = 200         # number of nodes (single node type)
    F_in = 48       # in_feat
    F_out = 40      # out_feat
    R = 3           # len(rel_names)
    num_bases = 2   # num_bases < R  -> use_basis=True

    key = jax.random.PRNGKey(0)
    k_adj, k_x, k_basis, k_comp, k_loop = jax.random.split(key, 5)

    # Dense per-relation adjacency A[r, dst, src] in {0, 1}.
    adj = (jax.random.uniform(k_adj, (R, N, N)) < 0.15).astype(jnp.float32)

    # Node features.
    x = jax.random.normal(k_x, (N, F_in), dtype=jnp.float32)

    # Parameters, xavier-uniform-style deterministic init (gain = sqrt(2), relu).
    gain = float(np.sqrt(2.0))

    def xavier(k, shape, fan_in, fan_out):
        bound = gain * np.sqrt(6.0 / (fan_in + fan_out))
        return jax.random.uniform(k, shape, jnp.float32, -bound, bound)

    # WeightBasis: basis weights [num_bases, F_in, F_out], coefficients [R, num_bases].
    basis_w = xavier(k_basis, (num_bases, F_in, F_out), F_in, F_out)
    w_comp = xavier(k_comp, (R, num_bases), num_bases, R)
    w_rel = jnp.einsum("rb,bio->rio", w_comp, basis_w)                    # [R, F_in, F_out]

    # Self-loop weight and bias (nn.init.zeros_ for the bias).
    w_loop = xavier(k_loop, (F_in, F_out), F_in, F_out)
    bias = jnp.zeros((F_out,), dtype=jnp.float32)

    out = rel_graph_conv_layer(adj, x, w_rel, w_loop, bias, tn=128, ts=128)
    out = jax.block_until_ready(out)

    ref = reference(adj, x, w_rel, w_loop, bias)
    # bf16 message operands (f32 accumulation) => ~1e-3 relative error budget.
    np.testing.assert_allclose(np.asarray(out), np.asarray(ref), rtol=2e-2, atol=2e-2)

    print("KERNEL_OK")
</pallas_src>

<mosaic_0001>
module attributes {stable_mosaic.version = 11 : i64} {
  func.func @rgcn_kernel(%arg0: i32, %arg1: i32, %arg2: memref<3x128x128xbf16, #tpu.memory_space<vmem>>, %arg3: memref<3x128x128xbf16, #tpu.memory_space<vmem>>, %arg4: memref<128x128xf32, #tpu.memory_space<vmem>>, %arg5: memref<1x128xf32, #tpu.memory_space<vmem>>, %arg6: memref<128x128xf32, #tpu.memory_space<vmem>>, %arg7: memref<128x128xf32, #tpu.memory_space<vmem>>) attributes {dimension_semantics = [#tpu.dimension_semantics<parallel>, #tpu.dimension_semantics<arbitrary>], iteration_bounds = array<i64: 2, 2>, scalar_prefetch = 0 : i64, scratch_operands = 1 : i64, tpu.core_type = #tpu.core_type<tc>, window_params = [{transform_indices = @transform_0, window_bounds = array<i64: 3, 128, 128>}, {transform_indices = @transform_1, window_bounds = array<i64: 3, 128, 128>}, {transform_indices = @transform_2, window_bounds = array<i64: 128, 128>}, {pipeline_mode = #tpu.pipeline_mode<synchronous>, transform_indices = @transform_3, window_bounds = array<i64: 1, 128>}, {transform_indices = @transform_4, window_bounds = array<i64: 128, 128>}]} {
    %c0_i32 = arith.constant 0 : i32
    %0 = arith.cmpi eq, %arg1, %c0_i32 : i32
    %1 = arith.extui %0 : i1 to i32
    %c0_i32_0 = arith.constant 0 : i32
    %2 = arith.cmpi ne, %1, %c0_i32_0 : i32
    scf.if %2 {
      %c0_31 = arith.constant 0 : index
      %c0_32 = arith.constant 0 : index
      %30 = vector.load %arg4[%c0_31, %c0_32] : memref<128x128xf32, #tpu.memory_space<vmem>>, vector<128x128xf32>
      %c0_33 = arith.constant 0 : index
      %c0_34 = arith.constant 0 : index
      %31 = vector.load %arg7[%c0_33, %c0_34] : memref<128x128xf32, #tpu.memory_space<vmem>>, vector<128x128xf32>
      tpu.vector_store %arg7[%c0_33, %c0_34], %30 {strides = array<i32>} : memref<128x128xf32, #tpu.memory_space<vmem>>, vector<128x128xf32>,
    } else {
    }
    %c0 = arith.constant 0 : index
    %c0_1 = arith.constant 0 : index
    %3 = vector.load %arg7[%c0, %c0_1] : memref<128x128xf32, #tpu.memory_space<vmem>>, vector<128x128xf32>
    %c0_2 = arith.constant 0 : index
    %c0_3 = arith.constant 0 : index
    %c0_4 = arith.constant 0 : index
    %4 = vector.load %arg2[%c0_2, %c0_3, %c0_4] : memref<3x128x128xbf16, #tpu.memory_space<vmem>>, vector<1x128x128xbf16>
    %5 = vector.shape_cast %4 : vector<1x128x128xbf16> to vector<128x128xbf16>
    %c0_5 = arith.constant 0 : index
    %c0_6 = arith.constant 0 : index
    %c0_7 = arith.constant 0 : index
    %6 = vector.load %arg3[%c0_5, %c0_6, %c0_7] : memref<3x128x128xbf16, #tpu.memory_space<vmem>>, vector<1x128x128xbf16>
    %7 = vector.shape_cast %6 : vector<1x128x128xbf16> to vector<128x128xbf16>
    %cst = arith.constant dense<0.000000e+00> : vector<128x128xf32>
    %8 = tpu.matmul %5, %7, %cst {dimension_numbers = #tpu.dot_dimension_numbers<[1], [0], [0], [1], [0, 0, 1, 1], [], []>} : vector<128x128xbf16>, vector<128x128xbf16>, vector<128x128xf32> -> vector<128x128xf32>
    %9 = arith.addf %3, %8 : vector<128x128xf32>
    %c0_8 = arith.constant 0 : index
    %c0_9 = arith.constant 0 : index
    %10 = vector.load %arg7[%c0_8, %c0_9] : memref<128x128xf32, #tpu.memory_space<vmem>>, vector<128x128xf32>
    tpu.vector_store %arg7[%c0_8, %c0_9], %9 {strides = array<i32>} : memref<128x128xf32, #tpu.memory_space<vmem>>, vector<128x128xf32>,
    %c0_10 = arith.constant 0 : index
    %c0_11 = arith.constant 0 : index
    %11 = vector.load %arg7[%c0_10, %c0_11] : memref<128x128xf32, #tpu.memory_space<vmem>>, vector<128x128xf32>
    %c1 = arith.constant 1 : index
    %c0_12 = arith.constant 0 : index
    %c0_13 = arith.constant 0 : index
    %12 = vector.load %arg2[%c1, %c0_12, %c0_13] : memref<3x128x128xbf16, #tpu.memory_space<vmem>>, vector<1x128x128xbf16>
    %13 = vector.shape_cast %12 : vector<1x128x128xbf16> to vector<128x128xbf16>
    %c1_14 = arith.constant 1 : index
    %c0_15 = arith.constant 0 : index
    %c0_16 = arith.constant 0 : index
    %14 = vector.load %arg3[%c1_14, %c0_15, %c0_16] : memref<3x128x128xbf16, #tpu.memory_space<vmem>>, vector<1x128x128xbf16>
    %15 = vector.shape_cast %14 : vector<1x128x128xbf16> to vector<128x128xbf16>
    %cst_17 = arith.constant dense<0.000000e+00> : vector<128x128xf32>
    %16 = tpu.matmul %13, %15, %cst_17 {dimension_numbers = #tpu.dot_dimension_numbers<[1], [0], [0], [1], [0, 0, 1, 1], [], []>} : vector<128x128xbf16>, vector<128x128xbf16>, vector<128x128xf32> -> vector<128x128xf32>
    %17 = arith.addf %11, %16 : vector<128x128xf32>
    %c0_18 = arith.constant 0 : index
    %c0_19 = arith.constant 0 : index
    %18 = vector.load %arg7[%c0_18, %c0_19] : memref<128x128xf32, #tpu.memory_space<vmem>>, vector<128x128xf32>
    tpu.vector_store %arg7[%c0_18, %c0_19], %17 {strides = array<i32>} : memref<128x128xf32, #tpu.memory_space<vmem>>, vector<128x128xf32>,
    %c0_20 = arith.constant 0 : index
    %c0_21 = arith.constant 0 : index
    %19 = vector.load %arg7[%c0_20, %c0_21] : memref<128x128xf32, #tpu.memory_space<vmem>>, vector<128x128xf32>
    %c2 = arith.constant 2 : index
    %c0_22 = arith.constant 0 : index
    %c0_23 = arith.constant 0 : index
    %20 = vector.load %arg2[%c2, %c0_22, %c0_23] : memref<3x128x128xbf16, #tpu.memory_space<vmem>>, vector<1x128x128xbf16>
    %21 = vector.shape_cast %20 : vector<1x128x128xbf16> to vector<128x128xbf16>
    %c2_24 = arith.constant 2 : index
    %c0_25 = arith.constant 0 : index
    %c0_26 = arith.constant 0 : index
    %22 = vector.load %arg3[%c2_24, %c0_25, %c0_26] : memref<3x128x128xbf16, #tpu.memory_space<vmem>>, vector<1x128x128xbf16>
    %23 = vector.shape_cast %22 : vector<1x128x128xbf16> to vector<128x128xbf16>
    %cst_27 = arith.constant dense<0.000000e+00> : vector<128x128xf32>
    %24 = tpu.matmul %21, %23, %cst_27 {dimension_numbers = #tpu.dot_dimension_numbers<[1], [0], [0], [1], [0, 0, 1, 1], [], []>} : vector<128x128xbf16>, vector<128x128xbf16>, vector<128x128xf32> -> vector<128x128xf32>
    %25 = arith.addf %19, %24 : vector<128x128xf32>
    %c0_28 = arith.constant 0 : index
    %c0_29 = arith.constant 0 : index
    %26 = vector.load %arg7[%c0_28, %c0_29] : memref<128x128xf32, #tpu.memory_space<vmem>>, vector<128x128xf32>
    tpu.vector_store %arg7[%c0_28, %c0_29], %25 {strides = array<i32>} : memref<128x128xf32, #tpu.memory_space<vmem>>, vector<128x128xf32>,
    %c1_i32 = arith.constant 1 : i32
    %27 = arith.cmpi eq, %arg1, %c1_i32 : i32
    %28 = arith.extui %27 : i1 to i32
    %c0_i32_30 = arith.constant 0 : i32
    %29 = arith.cmpi ne, %28, %c0_i32_30 : i32
    scf.if %29 {
      %c0_31 = arith.constant 0 : index
      %c0_32 = arith.constant 0 : index
      %30 = vector.load %arg7[%c0_31, %c0_32] : memref<128x128xf32, #tpu.memory_space<vmem>>, vector<128x128xf32>
      %c0_33 = arith.constant 0 : index
      %c0_34 = arith.constant 0 : index
      %31 = vector.load %arg5[%c0_33, %c0_34] : memref<1x128xf32, #tpu.memory_space<vmem>>, vector<1x128xf32>
      %32 = vector.broadcast %31 : vector<1x128xf32> to vector<128x128xf32>
      %33 = arith.addf %30, %32 : vector<128x128xf32>
      %cst_35 = arith.constant 0.000000e+00 : f32
      %34 = vector.broadcast %cst_35 : f32 to vector<128x128xf32>
      %35 = arith.maximumf %33, %34 : vector<128x128xf32>
      %c0_36 = arith.constant 0 : index
      %c0_37 = arith.constant 0 : index
      %36 = vector.load %arg6[%c0_36, %c0_37] : memref<128x128xf32, #tpu.memory_space<vmem>>, vector<128x128xf32>
      tpu.vector_store %arg6[%c0_36, %c0_37], %35 {strides = array<i32>} : memref<128x128xf32, #tpu.memory_space<vmem>>, vector<128x128xf32>,
    } else {
    }
    return
  }
  func.func @transform_0(%arg0: i32, %arg1: i32) -> (i32, i32, i32) {
    %c0_i32 = arith.constant 0 : i32
    %c0_i32_0 = arith.constant 0 : i32
    return %c0_i32, %arg0, %arg1 : i32, i32, i32
  }
  func.func @transform_1(%arg0: i32, %arg1: i32) -> (i32, i32, i32) {
    %c0_i32 = arith.constant 0 : i32
    %c0_i32_0 = arith.constant 0 : i32
    %c0_i32_1 = arith.constant 0 : i32
    return %c0_i32, %arg1, %c0_i32_0 : i32, i32, i32
  }
  func.func @transform_2(%arg0: i32, %arg1: i32) -> (i32, i32) {
    %c0_i32 = arith.constant 0 : i32
    %c0_i32_0 = arith.constant 0 : i32
    return %arg0, %c0_i32 : i32, i32
  }
  func.func @transform_3(%arg0: i32, %arg1: i32) -> (i32, i32) {
    %c0_i32 = arith.constant 0 : i32
    %c0_i32_0 = arith.constant 0 : i32
    %c0_i32_1 = arith.constant 0 : i32
    return %c0_i32, %c0_i32_0 : i32, i32
  }
  func.func @transform_4(%arg0: i32, %arg1: i32) -> (i32, i32) {
    %c0_i32 = arith.constant 0 : i32
    %c0_i32_0 = arith.constant 0 : i32
    return %arg0, %c0_i32 : i32, i32
  }
}

</mosaic_0001>

<bundles_post_ra>
// kernel: tpu_custom_call.1
= control target key start
LH: loop header
LB: loop body
LE: loop exit
PB: predicated region body
PF: predicated region fallthrough
CT: control target
= control target key end

     0   :  { %s2463_s0 = inlined_call_operand.hbm [shape: bf16[3,256,256], index: 0, kind: input, shape index: {}]   ;;  %s2464_s1 = inlined_call_operand.hbm [shape: bf16[3,256,128], index: 1, kind: input, shape index: {}]   ;;  %s2465_s2 = inlined_call_operand.hbm [shape: f32[256,128], index: 2, kind: input, shape index: {}]   ;;  %s2466_s3 = inlined_call_operand.vmem [shape: f32[1,128], index: 3, kind: input, shape index: {}]   ;;  %s2467_s4 = inlined_call_operand.hbm [shape: f32[256,128], index: 4, kind: output, shape index: {}]  }
   0x1   :  { %2478 = sst [smem:[#allocation32_spill]] %s2463_s0 }
   0x2   :  { %2479 = sst [smem:[#allocation33_spill]] %s2466_s3 }
   0x3   :  { %2480 = sst [smem:[#allocation34_spill]] %s2467_s4 }
   0x4   :  { %9 = vsyncpa [#allocation4], 0 }
   0x5   :  { %11 = vsyncpa [#allocation4 + $0x1], 0 }
   0x6   :  { %12 = vsyncpa [#allocation7], 0 }
   0x7   :  { %14 = vsyncpa [#allocation7 + $0x1], 0 }
   0x8   :  { %15 = vsyncpa [#allocation5], 0 }
   0x9   :  { %17 = vsyncpa [#allocation5 + $0x1], 0  ;;  %s2046_s15 = smov 0   ;;  %s2048_s16 = smov 0  }
   0xa   :  { %s2050_s17 = smov 0   ;;  %s2052_s18 = smov 0  }
   0xb   :  { %s2054_s19 = smov 0   ;;  %s2056_s20 = smov 0  }
   0xc   :  { %s2058_s21 = smov 0   ;;  %s2060_s22 = smov 0  }
   0xd   :  { %s2062_s23 = smov 0   ;;  %s2064_s24 = smov 0  }
   0xe   :  { %s2066_s25 = smov 0   ;;  %s2068_s26 = smov 0  }
   0xf   :  { %s2070_s27 = smov 0   ;;  %s2072_s28 = smov 0  }
  0x10 LB: > { %2481 = sst [smem:[#allocation20_spill]] %s1950_s15  ;;  %s2115_s29 = sadd.s32 4294967295, %s2002_s28   ;;  %s2002_s28 = sphi %s2072_s28, %s23_s28   ;;  %s1998_s27 = sphi %s2070_s27, %s2531_s27   ;;  %s1994_s26 = sphi %s2068_s26, %s2530_s26   ;;  %s1990_s25 = sphi %s2066_s25, %s2529_s25   ;;  %s1986_s24 = sphi %s2064_s24, %s2528_s24   ;;  %s1982_s23 = sphi %s2062_s23, %s2516_s23   ;;  %s1978_s22 = sphi %s2060_s22, %s2527_s22   ;;  %s1974_s21 = sphi %s2058_s21, %s2526_s21   ;;  %s1970_s20 = sphi %s2056_s20, %s2525_s20   ;;  %s1966_s19 = sphi %s2054_s19, %s2524_s19   ;;  %s1962_s18 = sphi %s2052_s18, %s2523_s18   ;;  %s1958_s17 = sphi %s2050_s17, %s2522_s17   ;;  %s1954_s16 = sphi %s2048_s16, %s2521_s16   ;;  %s1950_s15 = sphi %s2046_s15, %s2520_s15  }
  0x11   : > { %2482 = sst [smem:[#allocation21_spill]] %s1982_s23  ;;  %s32_s5 = sadd.s32 1, %s1994_s26 }
  0x12   : > { %2483 = sst [smem:[#allocation22_spill]] %s1986_s24  ;;  %s35_s6 = sadd.s32 1, %s1998_s27 }
  0x13   : > { %2484 = sst [smem:[#allocation23_spill]] %s1990_s25  ;;  %p33_p0 = scmp.ge.s32.totalorder %s32_s5, 2 }
  0x14   : > { %s44_s7 = sadd.s32 1, %s1982_s23  ;;  %p51_p1 = scmp.ne.s32.totalorder %s1982_s23, %s1978_s22 }
  0x15   : > { %p52_p2 = scmp.eq.s32.totalorder %s2002_s28, 0  ;;  %s2533_s5 = smov (%p33_p0, %s32_s5), 0 }
  0x16   : > { %2485 = sst [smem:[#allocation24_spill]] %s2533_s5  ;;  %s2535_s6 = smov (!%p33_p0, %s35_s6), %s1998_s27 }
  0x17   : > { %s40_s8 = ssub.s32 %s1994_s26, %s2533_s5  ;;  %p2131_p3 = por %p52_p2, %p51_p1 }
  0x18   : > { %p37_p4 = scmp.ge.s32.totalorder %s2535_s6, 2  ;;  %p57_p5 = scmp.ne.s32.totalorder %s1978_s22, %s1974_s21 }
  0x19   : > { %p58_p6 = scmp.eq.s32.totalorder %s2115_s29, 0  ;;  %p68_p7 = scmp.eq.s32.totalorder %s40_s8, 0 }
  0x1a   : > { %s2537_s6 = smov (%p37_p4, %s2535_s6), 0  ;;  %s70_s11 = sadd.s32 1, %s1970_s20 }
  0x1b   : > { %2487 = sst [smem:[#allocation25_spill]] %s2537_s6  ;;  %p2141_p8 = por %p58_p6, %p57_p5 }
  0x1c   : > { %s39_s12 = ssub.s32 %s1998_s27, %s2537_s6  ;;  %p77_p9 = scmp.ne.s32.totalorder %s1970_s20, %s1966_s19 }
  0x1d   : > { %s41_s13 = sor.u32 %s40_s8, %s39_s12  ;;  %p83_p10 = scmp.ne.s32.totalorder %s1966_s19, %s1962_s18 }
  0x1e   : > { %p42_p11 = scmp.eq.s32.totalorder %s41_s13, 0  ;;  %p2154_p12 = por %p77_p9, %p52_p2 }
  0x1f   : > { %s2159_s21 = scalar_select %p68_p7, %s1970_s20, %s70_s11  }
  0x20   : > { %s2162_s30 = scalar_select %p42_p11, %s1982_s23, %s44_s7  }
  0x21   : > { %2490 = sst [smem:[#allocation26_spill]] %s2159_s21  ;;  %p2166_p13 = por %p83_p10, %p58_p6 }
  0x22   : > { %2491 = sst [smem:[#allocation27_spill]] %s2162_s30  ;;  %p94_p0 = scmp.eq.s32.totalorder %s39_s12, 0 }
  0x23   : > { %s96_s6 = sadd.s32 1, %s1958_s17  ;;  %p103_p1 = scmp.ne.s32.totalorder %s1958_s17, %s1954_s16 }
  0x24   : > { %s2174_s8 = scalar_select %p94_p0, %s1958_s17, %s96_s6  }
  0x25   : > { %p2178_p4 = por %p103_p1, %p52_p2  ;;  %p109_p5 = scmp.ne.s32.totalorder %s1954_s16, %s1950_s15 }
  0x26   : > { %2493 = sst [smem:[#allocation28_spill]] %s2174_s8  ;;  %p154_p7 = scmp.eq.s32.totalorder %s2115_s29, 3 }
  0x27   : > { %s2495_s11 = sadd.s32 4294967294, %s2002_s28   ;;  %p2189_p11 = por %p109_p5, %p58_p6 }
  0x28   : > { %p160_p9 = scmp.eq.s32.totalorder %s2495_s11, 3  ;;  %p2193_p10 = por %p154_p7, %p103_p1 }
  0x29   : > { %s2496_s7 = scalar_select %p2189_p11, 1, 0 }
  0x2a   : > { %s2498_s12 = scalar_select %p2193_p10, 1, 0 }
  0x2b   : > { %2497 = sst [smem:[#allocation29_spill]] %s2496_s7  ;;  %p2197_p0 = por %p160_p9, %p109_p5 }
  0x2c   : > { %2499 = sst [smem:[#allocation30_spill]] %s2498_s12  ;;  %p1304_p2 = scmp.ge.s32.totalorder %s2002_s28, 4 }
  0x2d   : > { %s2500_s6 = scalar_select %p2197_p0, 1, 0 }
  0x2e   : > { %179 = sbr.rel (%p1304_p2) target bundleno = 87 (0x57), region = 20 }
  0x2f   : > { %2501 = sst [smem:[#allocation31_spill]] %s2500_s6 }
  0x33   : > { %s183_s13 = sand.u32 1, %s1982_s23   ;;  %s1583_s11 = sshll.u32 %s1998_s27, 5 }
  0x34   : > { %s1659_s30 = smul.u32 192, %s183_s13  ;;  %s192_s21 = sadd.s32 %s1994_s26, %s1583_s11 }
  0x35   : > { %s1307_s8 = sshll.u32 %s192_s21, 2  ;;  %s2502_s0 = sld [smem:[#allocation32_spill]] }
  0x36   : > { %s187_s12 = scalar_lea.vmem [#allocation3], %s1659_s30  ;;  %s2004_s7 = smov 4096  }
  0x37   : > { %s209_s25 = sshll.u32 %s187_s12, 4  ;;  %1664 = sst [smem:[#allocation11]] (%p2131_p3), %s2004_s7  ;;  %s210_s25 = int_to_ptr.vmem [resolvable:$true] %s209_s25 }
  0x38   : > { %s1663_s3 = scalar_select %p2131_p3, [#allocation0], [#allocation14] }
  0x39   : > { %s2005_s21 = smov 1024   ;;  %s2006_s4 = smov 16  }
  0x3a   : > { %s199_s23 = sld [smem:[%s1663_s3]]   ;;  %s2007_s15 = smov 128  }
  0x3b   : > { %s194_s6 = scalar_lea.hbm %s2502_s0, %s1307_s8  ;;  %1665 = sst [smem:[#allocation11 + $0x1]] (%p2131_p3), %s2005_s21 }
  0x3c   : > { %s207_s24 = sshll.u32 %s194_s6, 4  ;;  %1666 = sst [smem:[#allocation11 + $0x2]] (%p2131_p3), %s2006_s4  ;;  %s208_s24 = int_to_ptr.hbm [resolvable:$true] %s207_s24 }
  0x3d   : > { %1667 = sst [smem:[#allocation11 + $0x3]] (%p2131_p3), %s2007_s15  ;;  %s2008_s30 = smov 64  }
  0x3e   : > { %1668 = sst [smem:[#allocation11 + $0x4]] (%p2131_p3), %s2008_s30  ;;  %s2009_s12 = smov 4  }
  0x3f   : > { %1669 = sst [smem:[#allocation11 + $0x5]] (%p2131_p3), %s2009_s12  ;;  %s184_s6 = scalar_lea.sflag [#allocation4], %s183_s13 }
  0x40   : > { %s1308_s8 = sshll.u32 %s199_s23, 26  ;;  %s2010_s11 = smov [#allocation10]  }
  0x41   : > { %s1309_s3 = sadd.s32 134217728, %s1308_s8 }
  0x42   : > { %1670 = dma.general (%p2131_p3), %s208_s24, 3072, %s210_s25, %s184_s6, %s2010_s11, [#allocation11], %s1309_s3, 0  }
  0x43   : > { %s232_s7 = sand.u32 1, %s2002_s28   ;;  %s234_s21 = sand.u32 1, %s1970_s20  }
  0x44   : > { %s1660_s4 = smul.u32 192, %s234_s21  ;;  %s1584_s15 = sshll.u32 %s1994_s26, 6 }
  0x45   : > { %s241_s8 = scalar_lea.hbm %s2464_s1, %s1584_s15  ;;  %s2011_s3 = smov 2048  }
  0x46   : > { %s1671_s13 = scalar_select %p2154_p12, [#allocation0], [#allocation15] }
  0x47   : > { %s254_s24 = sshll.u32 %s241_s8, 4  ;;  %s236_s25 = scalar_lea.vmem [#allocation6], %s1660_s4  ;;  %s255_s24 = int_to_ptr.hbm [resolvable:$true] %s254_s24 }
  0x48   : > { %s256_s9 = sshll.u32 %s236_s25, 4  ;;  %s246_s12 = sld [smem:[%s1671_s13]]   ;;  %s257_s9 = int_to_ptr.vmem [resolvable:$true] %s256_s9 }
  0x49   : > { %1672 = sst [smem:[#allocation13]] (%p2154_p12), %s2011_s3  ;;  %s2012_s6 = smov 1024  }
  0x4a   : > { %1673 = sst [smem:[#allocation13 + $0x1]] (%p2154_p12), %s2012_s6  ;;  %s2013_s11 = smov 16  }
  0x4b   : > { %1674 = sst [smem:[#allocation13 + $0x2]] (%p2154_p12), %s2013_s11  ;;  %s2014_s21 = smov 64  }
  0x4c   : > { %1675 = sst [smem:[#allocation13 + $0x3]] (%p2154_p12), %s2014_s21  ;;  %s2015_s23 = smov 4  }
  0x4d   : > { %1676 = sst [smem:[#allocation13 + $0x4]] (%p2154_p12), %s2014_s21  ;;  %s233_s30 = scalar_lea.sflag [#allocation7], %s232_s7 }
  0x4e   : > { %s1312_s15 = sshll.u32 %s246_s12, 26  ;;  %1677 = sst [smem:[#allocation13 + $0x5]] (%p2154_p12), %s2015_s23 }
  0x4f   : > { %s1313_s4 = sadd.s32 134217728, %s1312_s15  ;;  %s2016_s8 = smov [#allocation12]  }
  0x50   : > { %1678 = dma.general (%p2154_p12), %s255_s24, 3072, %s257_s9, %s233_s30, %s2016_s8, [#allocation13], %s1313_s4, 0  }
  0x51   : > { %s281_s13 = sand.u32 1, %s1958_s17   ;;  %s1585_s25 = sshll.u32 %s1998_s27, 7 }
  0x52   : > { %s1314_s3 = sshll.u32 %s281_s13, 7  ;;  %s288_s12 = scalar_lea.hbm %s2465_s2, %s1585_s25 }
  0x53   : > { %s289_s0 = sshll.u32 %s288_s12, 4  ;;  %s283_s21 = scalar_lea.vmem [#allocation8], %s1314_s3  ;;  %s290_s0 = int_to_ptr.hbm [resolvable:$true] %s289_s0 }
  0x54   : > { %s291_s15 = sshll.u32 %s283_s21, 4  ;;  %s2017_s23 = smov 128   ;;  %s292_s15 = int_to_ptr.vmem [resolvable:$true] %s291_s15 }
  0x55   : > { %s2018_s7 = smov 8  }
  0x56   : > { %1679 = dma.hbm_to_vmem [thread:$0]  (%p2178_p4), %s290_s0, 2048, %s292_s15, %s233_s30, %s2017_s23, %s2017_s23, %s2018_s7  }
  0x57 PF: > { %p1317_p3 = scmp.ge.s32.totalorder %s2002_s28, 1  ;;  %p299_p6 = scmp.lt.s32.totalorder %s2002_s28, 5 }
  0x59   : > { %p300_p12 = pnand %p1317_p3, %p299_p6 }
  0x5a   : > { %s305_s14 = sand.u32 (!%p300_p12), 1, %s1978_s22  }
  0x5b   : > { %303 = sbr.rel (%p300_p12) target bundleno = 436 (0x1b4), region = 36  ;;  %s306_s9 = scalar_lea.sflag (!%p300_p12), [#allocation4], %s305_s14 }
  0x5c   : > { %s1661_s24 = smul.u32 (!%p300_p12), 192, %s305_s14 }
  0x5e   : > { %s2256_s4 = scalar_lea.vmem (!%p300_p12), [#allocation3], %s1661_s24 }
  0x60   : > { %1933 = dma.done.wait (%p2141_p8), %s306_s9, 3072  }
  0x61   : > { %1935 = vsyncadd (%p2141_p8), %s306_s9, 4294964224  ;;  %s315_s0 = sand.u32 1, %s2115_s29   ;;  %s317_s18 = sand.u32 1, %s1966_s19  }
  0x62   : > { %s1662_s30 = smul.u32 192, %s317_s18  ;;  %s316_s8 = scalar_lea.sflag [#allocation7], %s315_s0 }
  0x64   : > { %s2264_s13 = scalar_lea.vmem [#allocation6], %s1662_s30 }
  0x65   : > { %1937 = dma.done.wait (%p2166_p13), %s316_s8, 3072  }
  0x66   : > { %1939 = vsyncadd (%p2166_p13), %s316_s8, 4294964224  ;;  %s327_s3 = sand.u32 1, %s1954_s16  }
  0x67   : > { %s1318_s10 = sshll.u32 %s327_s3, 7 }
  0x68   : > { %s2273_s6 = scalar_lea.vmem [#allocation8], %s1318_s10 }
  0x69   : > { %1941 = dma.done.wait (%p2189_p11), %s316_s8, 2048  }
  0x6a   : > { %1943 = vsyncadd (%p2189_p11), %s316_s8, 4294965248  ;;  %s2279_s29 = scalar_lea.vmem [#allocation9], %s1318_s10  ;;  %s2504_s11 = sld [smem:[#allocation22_spill]] }
  0x70   : > { %p1320_p8 = scmp.ne.s32.totalorder %s2504_s11, 0 }
  0x72   : > { %372 = sbr.rel (%p1320_p8) target bundleno = 136 (0x88), region = 52 }
  0x77   : > { %v373_v0 = vld [vmem:[%s2273_s6] sm:$0xff]  ;;  %v374_v1 = vld [vmem:[%s2273_s6 + $0x8] sm:$0xff]  ;;  %v375_v2 = vld [vmem:[%s2273_s6 + $0x10] sm:$0xff] }
  0x78   : > { %389 = vst [vmem:[#allocation2 + $0x30] sm:$0xff] %v373_v0  ;;  %v376_v3 = vld [vmem:[%s2273_s6 + $0x18] sm:$0xff]  ;;  %v377_v4 = vld [vmem:[%s2273_s6 + $0x20] sm:$0xff]  ;;  %v378_v5 = vld [vmem:[%s2273_s6 + $0x28] sm:$0xff] }
  0x79   : > { %390 = vst [vmem:[#allocation2] sm:$0xff] %v374_v1  ;;  %v379_v6 = vld [vmem:[%s2273_s6 + $0x30] sm:$0xff]  ;;  %v380_v7 = vld [vmem:[%s2273_s6 + $0x38] sm:$0xff]  ;;  %v381_v8 = vld [vmem:[%s2273_s6 + $0x40] sm:$0xff] }
  0x7a   : > { %391 = vst [vmem:[#allocation2 + $0x58] sm:$0xff] %v375_v2  ;;  %v382_v9 = vld [vmem:[%s2273_s6 + $0x48] sm:$0xff]  ;;  %v383_v10 = vld [vmem:[%s2273_s6 + $0x50] sm:$0xff]  ;;  %v384_v11 = vld [vmem:[%s2273_s6 + $0x58] sm:$0xff] }
  0x7b   : > { %392 = vst [vmem:[#allocation2 + $0x18] sm:$0xff] %v376_v3  ;;  %v385_v12 = vld [vmem:[%s2273_s6 + $0x60] sm:$0xff]  ;;  %v386_v13 = vld [vmem:[%s2273_s6 + $0x68] sm:$0xff]  ;;  %v387_v14 = vld [vmem:[%s2273_s6 + $0x70] sm:$0xff] }
  0x7c   : > { %393 = vst [vmem:[#allocation2 + $0x50] sm:$0xff] %v377_v4  ;;  %v388_v15 = vld [vmem:[%s2273_s6 + $0x78] sm:$0xff] }
  0x7d   : > { %394 = vst [vmem:[#allocation2 + $0x68] sm:$0xff] %v378_v5 }
  0x7e   : > { %395 = vst [vmem:[#allocation2 + $0x8] sm:$0xff] %v379_v6 }
  0x7f   : > { %396 = vst [vmem:[#allocation2 + $0x48] sm:$0xff] %v380_v7 }
  0x80   : > { %397 = vst [vmem:[#allocation2 + $0x40] sm:$0xff] %v381_v8 }
  0x81   : > { %398 = vst [vmem:[#allocation2 + $0x20] sm:$0xff] %v382_v9 }
  0x82   : > { %399 = vst [vmem:[#allocation2 + $0x10] sm:$0xff] %v383_v10 }
  0x83   : > { %400 = vst [vmem:[#allocation2 + $0x38] sm:$0xff] %v384_v11 }
  0x84   : > { %401 = vst [vmem:[#allocation2 + $0x60] sm:$0xff] %v385_v12 }
  0x85   : > { %402 = vst [vmem:[#allocation2 + $0x70] sm:$0xff] %v386_v13 }
  0x86   : > { %403 = vst [vmem:[#allocation2 + $0x78] sm:$0xff] %v387_v14 }
  0x87   : > { %404 = vst [vmem:[#allocation2 + $0x28] sm:$0xff] %v388_v15 }
  0x88 PF: > { %v1601_v16 = vld [vmem:[%s2264_s13 + $0x38] sm:$0xff]  ;;  %v1600_v19 = vld [vmem:[%s2264_s13 + $0x30] sm:$0xff]  ;;  %v1599_v22 = vld [vmem:[%s2264_s13 + $0x28] sm:$0xff]  ;;  %s2505_s5 = sld [smem:[#allocation22_spill]] }
  0x89   : > { %v1617_v17 = vld [vmem:[%s2264_s13 + $0x78] sm:$0xff]  ;;  %549 = vmatpush.bf16.msra.mxu0 %v1601_v16  ;;  %1635 = vmatpush.bf16.msra.mxu3 %v1601_v16  ;;  %v1616_v20 = vld [vmem:[%s2264_s13 + $0x70] sm:$0xff]  ;;  %v1615_v23 = vld [vmem:[%s2264_s13 + $0x68] sm:$0xff] }
  0x8a   : > { %v2301_v18 = vld [vmem:[%s2264_s13 + $0xb8] sm:$0xff]  ;;  %776 = vmatpush.bf16.msra.mxu1 %v1617_v17  ;;  %v2307_v21 = vld [vmem:[%s2264_s13 + $0xb0] sm:$0xff]  ;;  %v2313_v24 = vld [vmem:[%s2264_s13 + $0xa8] sm:$0xff] }
  0x8b   : > { %1003 = vmatpush.bf16.msra.mxu2 %v2301_v18  ;;  %v1598_v25 = vld [vmem:[%s2264_s13 + $0x20] sm:$0xff]  ;;  %v1597_v28 = vld [vmem:[%s2264_s13 + $0x18] sm:$0xff]  ;;  %v1596_v31 = vld [vmem:[%s2264_s13 + $0x10] sm:$0xff] }
  0x8c   : > { %v1614_v26 = vld [vmem:[%s2264_s13 + $0x60] sm:$0xff]  ;;  %v1613_v29 = vld [vmem:[%s2264_s13 + $0x58] sm:$0xff]  ;;  %v1612_v32 = vld [vmem:[%s2264_s13 + $0x50] sm:$0xff] }
  0x8d   : > { %550 = vmatpush.bf16.msra.mxu0 %v1600_v19  ;;  %1636 = vmatpush.bf16.msra.mxu3 %v1600_v19  ;;  %v2319_v27 = vld [vmem:[%s2264_s13 + $0xa0] sm:$0xff]  ;;  %v1629_v30 = vld [vmem:[%s2264_s13 + $0x98] sm:$0xff]  ;;  %v1628_v33 = vld [vmem:[%s2264_s13 + $0x90] sm:$0xff] }
  0x8e   : > { %777 = vmatpush.bf16.msra.mxu1 %v1616_v20  ;;  %v1595_v34 = vld [vmem:[%s2264_s13 + $0x8] sm:$0xff]  ;;  %v1594_v37 = vld [vmem:[%s2264_s13] sm:$0xff]  ;;  %v1592_v41 = vld [vmem:[%s2256_s4 + $0x30] sm:$0xff]  ;;  %p1577_p13 = scmp.ne.s32.totalorder %s2505_s5, 1 }
  0x8f   : > { %1004 = vmatpush.bf16.msra.mxu2 %v2307_v21  ;;  %v1611_v35 = vld [vmem:[%s2264_s13 + $0x48] sm:$0xff]  ;;  %v1610_v38 = vld [vmem:[%s2264_s13 + $0x40] sm:$0xff]  ;;  %v1593_v45 = vld [vmem:[%s2256_s4 + $0x38] sm:$0xff]  ;;  %s2506_s15 = sld [smem:[#allocation33_spill]] (!%p1577_p13) }
  0x90   : > { %v1627_v36 = vld [vmem:[%s2264_s13 + $0x88] sm:$0xff]  ;;  %v1626_v39 = vld [vmem:[%s2264_s13 + $0x80] sm:$0xff]  ;;  %v1588_v48 = vld [vmem:[%s2256_s4 + $0x10] sm:$0xff] }
  0x91   : > { %551 = vmatpush.bf16.msra.mxu0 %v1599_v22  ;;  %1637 = vmatpush.bf16.msra.mxu3 %v1599_v22  ;;  %v1586_v40 = vld [vmem:[%s2256_s4] sm:$0xff]  ;;  %v1587_v44 = vld [vmem:[%s2256_s4 + $0x8] sm:$0xff]  ;;  %v1608_v49 = vld [vmem:[%s2256_s4 + $0x70] sm:$0xff] }
  0x92   : > { %778 = vmatpush.bf16.msra.mxu1 %v1615_v23  ;;  %v1602_v42 = vld [vmem:[%s2256_s4 + $0x40] sm:$0xff]  ;;  %v1603_v46 = vld [vmem:[%s2256_s4 + $0x48] sm:$0xff]  ;;  %v1604_v50 = vld [vmem:[%s2256_s4 + $0x50] sm:$0xff] }
  0x93   : > { %1005 = vmatpush.bf16.msra.mxu2 %v2313_v24  ;;  %v1618_v43 = vld [vmem:[%s2256_s4 + $0x80] sm:$0xff]  ;;  %v1619_v47 = vld [vmem:[%s2256_s4 + $0x88] sm:$0xff]  ;;  %v1620_v51 = vld [vmem:[%s2256_s4 + $0x90] sm:$0xff] }
  0x94   : > { %v1589_v52 = vld [vmem:[%s2256_s4 + $0x18] sm:$0xff]  ;;  %v1590_v56 = vld [vmem:[%s2256_s4 + $0x20] sm:$0xff]  ;;  %v1624_v57 = vld [vmem:[%s2256_s4 + $0xb0] sm:$0xff] }
  0x95   : > { %552 = vmatpush.bf16.msra.mxu0 %v1598_v25  ;;  %1638 = vmatpush.bf16.msra.mxu3 %v1598_v25  ;;  %v1609_v53 = vld [vmem:[%s2256_s4 + $0x78] sm:$0xff]  ;;  %v1606_v58 = vld [vmem:[%s2256_s4 + $0x60] sm:$0xff]  ;;  %v1591_v60 = vld [vmem:[%s2256_s4 + $0x28] sm:$0xff] }
  0x96   : > { %779 = vmatpush.bf16.msra.mxu1 %v1614_v26  ;;  %v1605_v54 = vld [vmem:[%s2256_s4 + $0x58] sm:$0xff]  ;;  %v1622_v59 = vld [vmem:[%s2256_s4 + $0xa0] sm:$0xff]  ;;  %v1607_v62 = vld [vmem:[%s2256_s4 + $0x68] sm:$0xff] }
  0x97   : > { %1006 = vmatpush.bf16.msra.mxu2 %v2319_v27  ;;  %v1621_v55 = vld [vmem:[%s2256_s4 + $0x98] sm:$0xff]  ;;  %v1623_v63 = vld [vmem:[%s2256_s4 + $0xa8] sm:$0xff]  ;;  %v405_v0 = vld [vmem:[#allocation2 + $0x30] sm:$0xff] }
  0x98   : > { %v1625_v61 = vld [vmem:[%s2256_s4 + $0xb8] sm:$0xff]  ;;  %v406_v6 = vld [vmem:[#allocation2] sm:$0xff] }
  0x99   : > { %553 = vmatpush.bf16.msra.mxu0 %v1597_v28  ;;  %1639 = vmatpush.bf16.msra.mxu3 %v1597_v28  ;;  %v407_v13 = vld [vmem:[#allocation2 + $0x58] sm:$0xff] }
  0x9a   : > { %780 = vmatpush.bf16.msra.mxu1 %v1613_v29  ;;  %v408_v22 = vld [vmem:[#allocation2 + $0x18] sm:$0xff] }
  0x9b   : > { %1007 = vmatpush.bf16.msra.mxu2 %v1629_v30 }
  0x9d   : > { %554 = vmatpush.bf16.msra.mxu0 %v1596_v31  ;;  %1640 = vmatpush.bf16.msra.mxu3 %v1596_v31 }
  0x9e   : > { %781 = vmatpush.bf16.msra.mxu1 %v1612_v32 }
  0x9f   : > { %1008 = vmatpush.bf16.msra.mxu2 %v1628_v33 }
  0xa1   : > { %555 = vmatpush.bf16.msra.mxu0 %v1595_v34  ;;  %1641 = vmatpush.bf16.msra.mxu3 %v1595_v34 }
  0xa2   : > { %782 = vmatpush.bf16.msra.mxu1 %v1611_v35 }
  0xa3   : > { %1009 = vmatpush.bf16.msra.mxu2 %v1627_v36 }
  0xa5   : > { %556 = vmatpush.bf16.msra.mxu0 %v1594_v37  ;;  %1642 = vmatpush.bf16.msra.mxu3 %v1594_v37 }
  0xa6   : > { %783 = vmatpush.bf16.msra.mxu1 %v1610_v38 }
  0xa7   : > { %1010 = vmatpush.bf16.msra.mxu2 %v1626_v39 }
  0xa8   : > { %557 = vmatmul.bf16.vlgmr.msra.gmra.mxu0 %v1586_v40  ;;  %587 = vmatmul.bf16.vlgmr.msra.gmra.mxu3 %v1592_v41 }
  0xa9   : > { %1643 = vmatpush.bf16.msrb.mxu3 %v1617_v17  ;;  %784 = vmatmul.bf16.vlgmr.msra.gmra.mxu1 %v1602_v42 }
  0xaa   : > { %1011 = vmatmul.bf16.vlgmr.msra.gmra.mxu2 %v1618_v43 }
  0xad   : > { %1644 = vmatpush.bf16.msrb.mxu3 %v1616_v20 }
  0xb1   : > { %1645 = vmatpush.bf16.msrb.mxu3 %v1615_v23 }
  0xb5   : > { %1646 = vmatpush.bf16.msrb.mxu3 %v1614_v26 }
  0xb8   : > { %562 = vmatmul.bf16.gmra.mxu0 %v1587_v44  ;;  %592 = vmatmul.bf16.gmra.mxu3 %v1593_v45  ;;  %v411_v45 = vld [vmem:[#allocation2 + $0x8] sm:$0xff] }
  0xb9   : > { %1647 = vmatpush.bf16.msrb.mxu3 %v1613_v29  ;;  %789 = vmatmul.bf16.gmra.mxu1 %v1603_v46  ;;  %v409_v29 = vld [vmem:[#allocation2 + $0x50] sm:$0xff] }
  0xba   : > { %1016 = vmatmul.bf16.gmra.mxu2 %v1619_v47 }
  0xbd   : > { %1648 = vmatpush.bf16.msrb.mxu3 %v1612_v32 }
  0xc1   : > { %1649 = vmatpush.bf16.msrb.mxu3 %v1611_v35 }
  0xc5   : > { %1650 = vmatpush.bf16.msrb.mxu3 %v1610_v38  ;;  %v410_v38 = vld [vmem:[#allocation2 + $0x68] sm:$0xff] }
  0xc8   : > { %567 = vmatmul.bf16.gmra.mxu0 %v1588_v48  ;;  %814 = vmatmul.bf16.vlgmr.msrb.gmra.mxu3 %v1608_v49 }
  0xc9   : > { %1651 = vmatpush.bf16.msra.mxu3 %v2301_v18  ;;  %794 = vmatmul.bf16.gmra.mxu1 %v1604_v50 }
  0xca   : > { %1021 = vmatmul.bf16.gmra.mxu2 %v1620_v51 }
  0xcd   : > { %1652 = vmatpush.bf16.msra.mxu3 %v2307_v21 }
  0xd1   : > { %1653 = vmatpush.bf16.msra.mxu3 %v2313_v24 }
  0xd5   : > { %1654 = vmatpush.bf16.msra.mxu3 %v2319_v27 }
  0xd8   : > { %572 = vmatmul.bf16.gmra.mxu0 %v1589_v52  ;;  %819 = vmatmul.bf16.gmra.mxu3 %v1609_v53 }
  0xd9   : > { %1655 = vmatpush.bf16.msra.mxu3 %v1629_v30  ;;  %799 = vmatmul.bf16.gmra.mxu1 %v1605_v54  ;;  %v412_v54 = vld [vmem:[#allocation2 + $0x48] sm:$0xff] }
  0xda   : > { %1026 = vmatmul.bf16.gmra.mxu2 %v1621_v55 }
  0xdd   : > { %1656 = vmatpush.bf16.msra.mxu3 %v1628_v33 }
  0xe1   : > { %1657 = vmatpush.bf16.msra.mxu3 %v1627_v36 }
  0xe5   : > { %1658 = vmatpush.bf16.msra.mxu3 %v1626_v39 }
  0xe8   : > { %577 = vmatmul.bf16.gmra.mxu0 %v1590_v56  ;;  %1041 = vmatmul.bf16.vlgmr.msra.gmra.mxu3 %v1624_v57 }
  0xe9   : > { %804 = vmatmul.bf16.gmra.mxu1 %v1606_v58 }
  0xea   : > { %1031 = vmatmul.bf16.gmra.mxu2 %v1622_v59 }
  0xf8   : > { %582 = vmatmul.bf16.gmra.mxu0 %v1591_v60  ;;  %1046 = vmatmul.bf16.gmra.mxu3 %v1625_v61  ;;  %v413_v61 = vld [vmem:[#allocation2 + $0x40] sm:$0xff] }
  0xf9   : > { %809 = vmatmul.bf16.gmra.mxu1 %v1607_v62 }
  0xfa   : > { %1036 = vmatmul.bf16.gmra.mxu2 %v1623_v63  ;;  %v417_v63 = vld [vmem:[#allocation2 + $0x60] sm:$0xff] }
 0x125   : > { %v558_v1 = vpop.f32.mrf.mxu0 }
 0x126   : > { %v598_v2 = vadd.f32 %v558_v1, %v405_v0  ;;  %v785_v3 = vpop.f32.mrf.mxu1 }
 0x128   : > { %v825_v4 = vadd.f32 %v785_v3, %v598_v2 }
 0x12b   : > { %v2362_v5 = vpop.f32.mrf.mxu3 }
 0x12d   : > { %v560_v7 = vpop.f32.mrf.mxu0  ;;  %v1012_v8 = vpop.f32.mrf.mxu2 }
 0x12e   : > { %v787_v9 = vpop.f32.mrf.mxu1  ;;  %v1052_v10 = vadd.f32 %v1012_v8, %v825_v4  ;;  %v599_v11 = vadd.f32 %v560_v7, %v406_v6  ;;  %v610_v6 = vadd.f32 %v2362_v5, %v417_v63 }
 0x130   : > { %1068 = vst [vmem:[#allocation2 + $0x30] sm:$0xff] %v1052_v10  ;;  %v826_v14 = vadd.f32 %v787_v9, %v599_v11  ;;  %v418_v11 = vld [vmem:[#allocation2 + $0x70] sm:$0xff] }
 0x133   : > { %v2364_v12 = vpop.f32.mrf.mxu3 }
 0x135   : > { %v563_v15 = vpop.f32.mrf.mxu0  ;;  %v1014_v16 = vpop.f32.mrf.mxu2 }
 0x136   : > { %v600_v17 = vadd.f32 %v563_v15, %v407_v13  ;;  %v790_v18 = vpop.f32.mrf.mxu1  ;;  %v1053_v19 = vadd.f32 %v1014_v16, %v826_v14  ;;  %v414_v13 = vld [vmem:[#allocation2 + $0x20] sm:$0xff] }
 0x138   : > { %1069 = vst [vmem:[#allocation2] sm:$0xff] %v1053_v19  ;;  %v827_v20 = vadd.f32 %v790_v18, %v600_v17  ;;  %v611_v18 = vadd.f32 %v2364_v12, %v418_v11 }
 0x13b   : > { %v2366_v21 = vpop.f32.mrf.mxu3 }
 0x13d   : > { %v565_v23 = vpop.f32.mrf.mxu0  ;;  %v1017_v24 = vpop.f32.mrf.mxu2 }
 0x13e   : > { %v792_v25 = vpop.f32.mrf.mxu1  ;;  %v1054_v26 = vadd.f32 %v1017_v24, %v827_v20  ;;  %v601_v27 = vadd.f32 %v565_v23, %v408_v22  ;;  %v415_v23 = vld [vmem:[#allocation2 + $0x10] sm:$0xff] }
 0x140   : > { %1070 = vst [vmem:[#allocation2 + $0x58] sm:$0xff] %v1054_v26  ;;  %v828_v30 = vadd.f32 %v792_v25, %v601_v27  ;;  %v419_v25 = vld [vmem:[#allocation2 + $0x78] sm:$0xff] }
 0x143   : > { %v2368_v28 = vpop.f32.mrf.mxu3 }
 0x145   : > { %v568_v31 = vpop.f32.mrf.mxu0  ;;  %v1019_v32 = vpop.f32.mrf.mxu2 }
 0x146   : > { %v602_v33 = vadd.f32 %v568_v31, %v409_v29  ;;  %v795_v34 = vpop.f32.mrf.mxu1  ;;  %v1055_v35 = vadd.f32 %v1019_v32, %v828_v30  ;;  %v612_v31 = vadd.f32 %v2366_v21, %v419_v25 }
 0x148   : > { %1071 = vst [vmem:[#allocation2 + $0x18] sm:$0xff] %v1055_v35  ;;  %v829_v36 = vadd.f32 %v795_v34, %v602_v33 }
 0x14b   : > { %v815_v37 = vpop.f32.mrf.mxu3 }
 0x14c   : > { %v837_v7 = vadd.f32 %v815_v37, %v610_v6  ;;  %v416_v37 = vld [vmem:[#allocation2 + $0x38] sm:$0xff] }
 0x14d   : > { %v570_v39 = vpop.f32.mrf.mxu0  ;;  %v1022_v40 = vpop.f32.mrf.mxu2 }
 0x14e   : > { %v797_v41 = vpop.f32.mrf.mxu1  ;;  %v1056_v42 = vadd.f32 %v1022_v40, %v829_v36  ;;  %v603_v43 = vadd.f32 %v570_v39, %v410_v38  ;;  %v420_v36 = vld [vmem:[#allocation2 + $0x28] sm:$0xff] }
 0x150   : > { %1072 = vst [vmem:[#allocation2 + $0x50] sm:$0xff] %v1056_v42  ;;  %v830_v46 = vadd.f32 %v797_v41, %v603_v43  ;;  %v613_v41 = vadd.f32 %v2368_v28, %v420_v36 }
 0x153   : > { %v817_v44 = vpop.f32.mrf.mxu3 }
 0x154   : > { %v838_v20 = vadd.f32 %v817_v44, %v611_v18 }
 0x155   : > { %v573_v47 = vpop.f32.mrf.mxu0  ;;  %v1024_v48 = vpop.f32.mrf.mxu2 }
 0x156   : > { %v604_v49 = vadd.f32 %v573_v47, %v411_v45  ;;  %v800_v50 = vpop.f32.mrf.mxu1  ;;  %v1057_v51 = vadd.f32 %v1024_v48, %v830_v46 }
 0x158   : > { %1073 = vst [vmem:[#allocation2 + $0x68] sm:$0xff] %v1057_v51  ;;  %v831_v52 = vadd.f32 %v800_v50, %v604_v49 }
 0x15b   : > { %v820_v53 = vpop.f32.mrf.mxu3 }
 0x15c   : > { %v839_v33 = vadd.f32 %v820_v53, %v612_v31 }
 0x15d   : > { %v575_v55 = vpop.f32.mrf.mxu0  ;;  %v1027_v56 = vpop.f32.mrf.mxu2 }
 0x15e   : > { %v802_v57 = vpop.f32.mrf.mxu1  ;;  %v1058_v58 = vadd.f32 %v1027_v56, %v831_v52  ;;  %v605_v59 = vadd.f32 %v575_v55, %v412_v54 }
 0x160   : > { %1074 = vst [vmem:[#allocation2 + $0x8] sm:$0xff] %v1058_v58  ;;  %v832_v62 = vadd.f32 %v802_v57, %v605_v59 }
 0x163   : > { %v822_v60 = vpop.f32.mrf.mxu3 }
 0x164   : > { %v840_v43 = vadd.f32 %v822_v60, %v613_v41 }
 0x165   : > { %v578_v0 = vpop.f32.mrf.mxu0  ;;  %v1029_v1 = vpop.f32.mrf.mxu2 }
 0x166   : > { %v606_v2 = vadd.f32 %v578_v0, %v413_v61  ;;  %v805_v3 = vpop.f32.mrf.mxu1  ;;  %v1059_v4 = vadd.f32 %v1029_v1, %v832_v62 }
 0x168   : > { %1075 = vst [vmem:[#allocation2 + $0x48] sm:$0xff] %v1059_v4  ;;  %v833_v8 = vadd.f32 %v805_v3, %v606_v2 }
 0x16b   : > { %v1042_v9 = vpop.f32.mrf.mxu3 }
 0x16c   : > { %v1064_v10 = vadd.f32 %v1042_v9, %v837_v7 }
 0x16d   : > { %v580_v14 = vpop.f32.mrf.mxu0  ;;  %v1032_v15 = vpop.f32.mrf.mxu2 }
 0x16e   : > { %1080 = vst [vmem:[#allocation2 + $0x60] sm:$0xff] %v1064_v10  ;;  %v1060_v16 = vadd.f32 %v1032_v15, %v833_v8  ;;  %v807_v17 = vpop.f32.mrf.mxu1  ;;  %v607_v19 = vadd.f32 %v580_v14, %v414_v13 }
 0x170   : > { %1076 = vst [vmem:[#allocation2 + $0x40] sm:$0xff] %v1060_v16  ;;  %v834_v5 = vadd.f32 %v807_v17, %v607_v19 }
 0x173   : > { %v1044_v22 = vpop.f32.mrf.mxu3 }
 0x174   : > { %v1065_v24 = vadd.f32 %v1044_v22, %v838_v20 }
 0x175   : > { %v583_v26 = vpop.f32.mrf.mxu0  ;;  %v1034_v27 = vpop.f32.mrf.mxu2 }
 0x176   : > { %1081 = vst [vmem:[#allocation2 + $0x70] sm:$0xff] %v1065_v24  ;;  %v608_v29 = vadd.f32 %v583_v26, %v415_v23  ;;  %v1061_v30 = vadd.f32 %v1034_v27, %v834_v5  ;;  %v810_v32 = vpop.f32.mrf.mxu1 }
 0x178   : > { %1077 = vst [vmem:[#allocation2 + $0x20] sm:$0xff] %v1061_v30  ;;  %v835_v34 = vadd.f32 %v810_v32, %v608_v29 }
 0x17b   : > { %v1047_v12 = vpop.f32.mrf.mxu3 }
 0x17c   : > { %v1066_v35 = vadd.f32 %v1047_v12, %v839_v33 }
 0x17d   : > { %v585_v38 = vpop.f32.mrf.mxu0  ;;  %v1037_v39 = vpop.f32.mrf.mxu2 }
 0x17e   : > { %1082 = vst [vmem:[#allocation2 + $0x78] sm:$0xff] %v1066_v35  ;;  %v1062_v40 = vadd.f32 %v1037_v39, %v835_v34  ;;  %v609_v42 = vadd.f32 %v585_v38, %v416_v37  ;;  %v812_v44 = vpop.f32.mrf.mxu1 }
 0x180   : > { %1078 = vst [vmem:[#allocation2 + $0x10] sm:$0xff] %v1062_v40  ;;  %v836_v21 = vadd.f32 %v812_v44, %v609_v42 }
 0x183   : > { %v1049_v45 = vpop.f32.mrf.mxu3 }
 0x184   : > { %v1067_v46 = vadd.f32 %v1049_v45, %v840_v43  ;;  %1087 = sbr.rel (%p1577_p13) target bundleno = 414 (0x19e), region = 56 }
 0x185   : > { %v1039_v47 = vpop.f32.mrf.mxu2 }
 0x186   : > { %1083 = vst [vmem:[#allocation2 + $0x28] sm:$0xff] %v1067_v46  ;;  %v1063_v48 = vadd.f32 %v1039_v47, %v836_v21 }
 0x188   : > { %1079 = vst [vmem:[#allocation2 + $0x38] sm:$0xff] %v1063_v48 }
 0x189   : > { %v1088_v49 = vld [vmem:[#allocation2 + $0x30] sm:$0xff]  ;;  %v1819_v50 = vld [vmem:[%s2506_s15] ss:$0 sm:$0xff]  ;;  %v1090_v51 = vld [vmem:[#allocation2 + $0x58] sm:$0xff] }
 0x18a   : > { %v1089_v28 = vld [vmem:[#allocation2] sm:$0xff]  ;;  %v1091_v52 = vld [vmem:[#allocation2 + $0x18] sm:$0xff]  ;;  %v1108_v53 = vadd.f32 %v1819_v50, %v1088_v49  ;;  %v1110_v55 = vadd.f32 %v1819_v50, %v1090_v51  ;;  %v1092_v57 = vld [vmem:[#allocation2 + $0x50] sm:$0xff] }
 0x18b   : > { %v1109_v54 = vadd.f32 %v1819_v50, %v1089_v28  ;;  %v1111_v56 = vadd.f32 %v1819_v50, %v1091_v52  ;;  %v1093_v58 = vld [vmem:[#allocation2 + $0x68] sm:$0xff]  ;;  %v1112_v60 = vadd.f32 %v1819_v50, %v1092_v57  ;;  %v1096_v63 = vld [vmem:[#allocation2 + $0x40] sm:$0xff]  ;;  %v1098_v8 = vld [vmem:[#allocation2 + $0x10] sm:$0xff] }
 0x18c   : > { %v1094_v59 = vld [vmem:[#allocation2 + $0x8] sm:$0xff]  ;;  %v1113_v61 = vadd.f32 %v1819_v50, %v1093_v58  ;;  %v1124_v0 = vmax.f32 %v1108_v53, 0.0  ;;  %v1126_v2 = vmax.f32 %v1110_v55, 0.0  ;;  %v1097_v4 = vld [vmem:[#allocation2 + $0x20] sm:$0xff]  ;;  %v1116_v10 = vadd.f32 %v1819_v50, %v1096_v63  ;;  %v1101_v18 = vld [vmem:[#allocation2 + $0x70] sm:$0xff] }
 0x18d   : > { %v1095_v62 = vld [vmem:[#allocation2 + $0x48] sm:$0xff]  ;;  %v1125_v1 = vmax.f32 %v1109_v54, 0.0  ;;  %v1114_v3 = vadd.f32 %v1819_v50, %v1094_v59  ;;  %v1127_v6 = vmax.f32 %v1111_v56, 0.0  ;;  %v1128_v9 = vmax.f32 %v1112_v60, 0.0  ;;  %v1100_v15 = vld [vmem:[#allocation2 + $0x60] sm:$0xff]  ;;  %v1102_v22 = vld [vmem:[#allocation2 + $0x78] sm:$0xff] }
 0x18e   : > { %v1115_v7 = vadd.f32 %v1819_v50, %v1095_v62  ;;  %1140 = vst [vmem:[%s2279_s29] sm:$0xff] %v1124_v0  ;;  %v1129_v13 = vmax.f32 %v1113_v61, 0.0  ;;  %v1117_v14 = vadd.f32 %v1819_v50, %v1097_v4  ;;  %v1118_v17 = vadd.f32 %v1819_v50, %v1098_v8  ;;  %v1103_v24 = vld [vmem:[#allocation2 + $0x28] sm:$0xff] }
 0x18f   : > { %v1099_v11 = vld [vmem:[#allocation2 + $0x38] sm:$0xff]  ;;  %1141 = vst [vmem:[%s2279_s29 + $0x8] sm:$0xff] %v1125_v1  ;;  %v1130_v16 = vmax.f32 %v1114_v3, 0.0  ;;  %v1132_v23 = vmax.f32 %v1116_v10, 0.0  ;;  %v1120_v5 = vadd.f32 %v1819_v50, %v1100_v15  ;;  %v1121_v26 = vadd.f32 %v1819_v50, %v1101_v18 }
 0x190   : > { %1142 = vst [vmem:[%s2279_s29 + $0x10] sm:$0xff] %v1126_v2  ;;  %v1131_v19 = vmax.f32 %v1115_v7, 0.0  ;;  %v1119_v20 = vadd.f32 %v1819_v50, %v1099_v11  ;;  %v1133_v25 = vmax.f32 %v1117_v14, 0.0  ;;  %v1134_v27 = vmax.f32 %v1118_v17, 0.0 }
 0x191   : > { %1143 = vst [vmem:[%s2279_s29 + $0x18] sm:$0xff] %v1127_v6  ;;  %v1122_v29 = vadd.f32 %v1819_v50, %v1102_v22  ;;  %v1123_v31 = vadd.f32 %v1819_v50, %v1103_v24  ;;  %v1136_v32 = vmax.f32 %v1120_v5, 0.0  ;;  %v1137_v33 = vmax.f32 %v1121_v26, 0.0 }
 0x192   : > { %1144 = vst [vmem:[%s2279_s29 + $0x20] sm:$0xff] %v1128_v9  ;;  %v1135_v30 = vmax.f32 %v1119_v20, 0.0 }
 0x193   : > { %1145 = vst [vmem:[%s2279_s29 + $0x28] sm:$0xff] %v1129_v13  ;;  %v1138_v34 = vmax.f32 %v1122_v29, 0.0  ;;  %v1139_v12 = vmax.f32 %v1123_v31, 0.0 }
 0x194   : > { %1146 = vst [vmem:[%s2279_s29 + $0x30] sm:$0xff] %v1130_v16 }
 0x195   : > { %1147 = vst [vmem:[%s2279_s29 + $0x38] sm:$0xff] %v1131_v19 }
 0x196   : > { %1148 = vst [vmem:[%s2279_s29 + $0x40] sm:$0xff] %v1132_v23 }
 0x197   : > { %1149 = vst [vmem:[%s2279_s29 + $0x48] sm:$0xff] %v1133_v25 }
 0x198   : > { %1150 = vst [vmem:[%s2279_s29 + $0x50] sm:$0xff] %v1134_v27 }
 0x199   : > { %1151 = vst [vmem:[%s2279_s29 + $0x58] sm:$0xff] %v1135_v30 }
 0x19a   : > { %1152 = vst [vmem:[%s2279_s29 + $0x60] sm:$0xff] %v1136_v32 }
 0x19b   : > { %1153 = vst [vmem:[%s2279_s29 + $0x68] sm:$0xff] %v1137_v33 }
 0x19c   : > { %1154 = vst [vmem:[%s2279_s29 + $0x70] sm:$0xff] %v1138_v34 }
 0x19d   : > { %1155 = vst [vmem:[%s2279_s29 + $0x78] sm:$0xff] %v1139_v12 }
 0x19e PF: > { %s2507_s23 = sld [smem:[#allocation23_spill]]  ;;  %s1169_s18 = sshll.u32 %s2279_s29, 4  ;;  %s1170_s18 = int_to_ptr.vmem [resolvable:$true] %s1169_s18 }
 0x19f   : > { %s2509_s4 = sld [smem:[#allocation34_spill]]  ;;  %s1157_s8 = scalar_lea.sflag [#allocation5], %s327_s3 }
 0x1a4   : > { %s1634_s14 = sshll.u32 %s2507_s23, 7 }
 0x1a5   : > { %s1168_s0 = scalar_lea.hbm %s2509_s4, %s1634_s14  ;;  %s1868_s11 = scalar_lea.hbm %s2509_s4, 256 }
 0x1a6   : > { %s1171_s30 = sshll.u32 %s1168_s0, 4  ;;  %s1172_s30 = int_to_ptr.hbm [resolvable:$true] %s1171_s30 }
 0x1a7   : > { %s1862_s13 = sshra.s32 %s1172_s30, 4  ;;  %s1863_s13 = int_to_ptr.hbm [resolvable:$true] %s1862_s13 }
 0x1a8   : > { %s1864_s25 = scalar_lea.hbm %s1863_s13, 128  ;;  %p1869_p7 = scmp.lt.s32.totalorder %s1863_s13, %s2509_s4 }
 0x1a9   : > { %p1865_p1 = scmp.ne.s32.totalorder %s1863_s13, %s1864_s25  ;;  %p1870_p9 = scmp.lt.s32.totalorder %s1868_s11, %s1864_s25 }
 0x1ab   : > { %p1866_p4 = pnand %p1865_p1, %p2193_p10  ;;  %p1871_p11 = por %p1870_p9, %p1869_p7 }
 0x1ad   : > { %p1867_p5 = pneg %p1866_p4 }
 0x1af   : > { %p1872_p2 = pnand %p1871_p11, %p1867_p5 }
 0x1b1   : > { %1875 = shalt.err (!%p1872_p2)
}
 0x1b2   : > { %s2019_s3 = smov 128   ;;  %s2020_s29 = smov 8  }
 0x1b3   : > { %1683 = dma.vmem_to_hbm [thread:$0]  (%p2193_p10), %s1170_s18, 2048, %s1172_s30, %s1157_s8, %s2019_s3, %s2019_s3, %s2020_s29  }
 0x1b4 PF: > { %s2510_s21 = sld [smem:[#allocation20_spill]]  ;;  %p1689_p3 = scmp.ge.s32.totalorder %s2002_s28, 2 }
 0x1b6   : > { %p1686_p6 = pnand %p1689_p3, %p2197_p0 }
 0x1b8   : > { %p1687_p12 = pneg %p1686_p6 }
 0x1ba   : > { %s1186_s23 = sand.u32 1, %s2510_s21  }
 0x1bb   : > { %s1187_s14 = scalar_lea.sflag [#allocation5], %s1186_s23 }
 0x1bc   : > { %1945 = dma.done.wait (%p1687_p12), %s1187_s14, 2048  }
 0x1bd   : > { %1947 = vsyncadd (%p1687_p12), %s1187_s14, 4294965248  ;;  %s23_s28 = sadd.s32 1, %s2002_s28   ;;  %s2513_s7 = sld [smem:[#allocation28_spill]] }
 0x1be   : > { %p2416_p8 = scmp.ge.s32.totalorder %s23_s28, 6   ;;  %s2514_s9 = sld [smem:[#allocation26_spill]] }
 0x1bf   : > { %s2515_s0 = sld [smem:[#allocation21_spill]]  ;;  %s2520_s15 = smov %s1954_s16 }
 0x1c0   : > { %s2516_s23 = sld [smem:[#allocation27_spill]]  ;;  %s2521_s16 = smov %s1958_s17 }
 0x1c1   : > { %s2517_s30 = sld [smem:[#allocation24_spill]]  ;;  %s2523_s18 = smov %s1966_s19 }
 0x1c2   : > { %s2518_s8 = sld [smem:[#allocation25_spill]]  ;;  %s2524_s19 = smov %s1970_s20 }
 0x1c3   : > { %s2522_s17 = smov %s2513_s7  ;;  %s2526_s21 = smov %s1978_s22 }
 0x1c4   : > { %s2525_s20 = smov %s2514_s9  ;;  %s2528_s24 = smov %s1994_s26 }
 0x1c5   : > { %s2527_s22 = smov %s2515_s0  ;;  %s2529_s25 = smov %s1998_s27 }
 0x1c6   :  { %22 = sbr.rel (!%p2416_p8) target bundleno = 16 (0x10), region = 127 }
 0x1c7   : > { %s2530_s26 = smov %s2517_s30 }
 0x1c8   : > { %s2531_s27 = smov %s2518_s8 }
 0x1cb   :  { %1193 = vsyncpa [#allocation4], 1 }
 0x1cc   :  { %1195 = vsyncpa [#allocation4 + $0x1], 1 }
 0x1cd   :  { %1196 = vsyncpa [#allocation7], 1 }
 0x1ce   :  { %1198 = vsyncpa [#allocation7 + $0x1], 1 }
 0x1cf   :  { %1199 = vsyncpa [#allocation5], 1 }
 0x1d0   :  { %1201 = vsyncpa [#allocation5 + $0x1], 1 }

</bundles_post_ra>
